<compile_context>
chip_gen: v6e
topology: v6e:2x2x1
jax: 0.10.0
libtpu: 0.0.40
codegen_flags: <defaults>
</compile_context>

<pallas_src>
import jax
import jax.numpy as jnp
from jax.experimental import pallas as pl
from jax.experimental.pallas import tpu as pltpu

LANE = 128
SUBLANE = 8


# ----------------------------------------------------------------------------
# Fused kernel: MLM head (restricted to mask rows / label-word columns)
#               + verbalizer (log-softmax -> per-class mean)
# ----------------------------------------------------------------------------
def fused_head_verbalizer_kernel(hm_ref, wd_ref, bd_ref, g_ref, be_ref,
                                 wsel_ref, bsel_ref, cls_ref, out_ref):
    # hm_ref: (bt, H) bf16 hidden states at the [MASK] positions (streamed).
    x = hm_ref[...]

    # MLM-head dense: bf16 MXU feed, f32 accumulate.
    t = jnp.dot(x, wd_ref[...], preferred_element_type=jnp.float32) + bd_ref[...]
    t = jax.nn.gelu(t, approximate=True)

    # LayerNorm (statistics in f32; rsqrt goes to the EUP slot).
    mu = jnp.mean(t, axis=-1, keepdims=True)
    var = jnp.mean(jnp.square(t - mu), axis=-1, keepdims=True)
    t = (t - mu) * jax.lax.rsqrt(var + 1e-12) * g_ref[...] + be_ref[...]

    # Decoder restricted to the label-word columns (padded to a 128-lane slab).
    # Padding lanes carry a finite -1e30 bias: exp() kills them in the softmax
    # and the zero rows of cls_ref keep them out of the class means w/o NaNs.
    picked = jnp.dot(t.astype(jnp.bfloat16), wsel_ref[...],
                     preferred_element_type=jnp.float32) + bsel_ref[...]  # (bt, CKp)

    # Log-softmax over the label-word lanes: one log per row instead of a
    # (bt, CKp) elementwise log + reciprocal chain.
    m = jnp.max(picked, axis=-1, keepdims=True)
    shifted = picked - m
    denom = jnp.sum(jnp.exp(shifted), axis=-1, keepdims=True)
    logp = shifted - jnp.log(denom)                                       # (bt, CKp)

    # Per-class mean of log-probs via a (CKp, Cp) averaging matrix.
    # Output is a lane-dense (bt, Cp=128) slab (unmasked vst).
    # NOTE: f32xf32 dot costs ~3x bf16 MXU passes, but is negligible at CKp=128.
    out_ref[...] = jnp.dot(logp, cls_ref[...], preferred_element_type=jnp.float32)


def _round_up(x, m):
    return pl.cdiv(x, m) * m


def fused_head_verbalizer(hm, wd, bd, gamma, beta, wsel, bsel, cls_mat):
    B, H = hm.shape
    CKp = wsel.shape[1]
    Cp = cls_mat.shape[1]

    # Pad the batch to a sublane multiple and pick a tile so the grid has at
    # least 2 "parallel" steps when possible (v7x: 2 TensorCores), capped at
    # 256 rows (amortizes per-step overhead, stays inside scoped VMEM).
    Bp = _round_up(B, SUBLANE)
    if Bp <= SUBLANE:
        bt = Bp
    else:
        bt = min(256, _round_up(pl.cdiv(Bp, 2), SUBLANE))
    Bp = _round_up(Bp, bt)
    if Bp != B:
        hm = jnp.pad(hm, ((0, Bp - B), (0, 0)))
    grid = (Bp // bt,)

    # Grid-invariant weights: single-buffered (constant index_map; a second
    # pipeline buffer would only waste VMEM).
    def const_spec(shape):
        return pl.BlockSpec(shape, lambda i: (0, 0), pipeline_mode=pl.Buffered(1))

    cost = pl.CostEstimate(
        flops=2 * Bp * H * H + 2 * Bp * H * CKp + 2 * Bp * CKp * Cp,
        transcendentals=Bp * (H + CKp) + Bp,
        bytes_accessed=(hm.size * hm.dtype.itemsize
                        + wd.size * wd.dtype.itemsize
                        + wsel.size * wsel.dtype.itemsize
                        + (bd.size + gamma.size + beta.size + bsel.size) * 4
                        + cls_mat.size * 4
                        + Bp * Cp * 4),
    )

    return pl.pallas_call(
        fused_head_verbalizer_kernel,
        out_shape=jax.ShapeDtypeStruct((Bp, Cp), jnp.float32),
        grid_spec=pltpu.PrefetchScalarGridSpec(
            num_scalar_prefetch=0,
            grid=grid,
            in_specs=[
                pl.BlockSpec((bt, H), lambda i: (i, 0)),  # streamed bf16 mask-row hiddens
                const_spec((H, H)),                       # dense weight (bf16)
                const_spec((1, H)),                       # dense bias
                const_spec((1, H)),                       # LN gamma
                const_spec((1, H)),                       # LN beta
                const_spec((H, CKp)),                     # decoder cols @ label words (bf16)
                const_spec((1, CKp)),                     # decoder bias (+ -1e30 pad lanes)
                const_spec((CKp, Cp)),                    # per-class averaging matrix
            ],
            out_specs=pl.BlockSpec((bt, Cp), lambda i: (i, 0)),
        ),
        compiler_params=pltpu.CompilerParams(
            dimension_semantics=("parallel",),            # batch tiles shard across TCs (v7x)
            vmem_limit_bytes=32 * 1024 * 1024,            # safe on v5e/v6e/v7x
        ),
        cost_estimate=cost,
    )(hm, wd, bd, gamma, beta, wsel, bsel, cls_mat)


# ----------------------------------------------------------------------------
# Weight preprocessing: slice decoder to label-word columns, pad to 128 lanes,
# cast matmul weights to bf16, build the per-class averaging matrix.
# ----------------------------------------------------------------------------
def prepare_head_params(raw, label_word_ids):
    C = len(label_word_ids)
    K = len(label_word_ids[0])
    CK = C * K
    CKp = _round_up(CK, LANE)
    Cp = _round_up(C, LANE)
    H = raw["wd"].shape[0]
    flat_ids = jnp.array([i for ids in label_word_ids for i in ids], dtype=jnp.int32)

    wsel = jnp.zeros((H, CKp), jnp.float32).at[:, :CK].set(raw["wdec"][:, flat_ids])
    # padding lanes get a finite -1e30 bias so exp() kills them in the softmax
    # (must stay finite: zero cls rows would turn -inf into NaN in the matmul).
    bsel = jnp.full((1, CKp), -1e30, jnp.float32).at[0, :CK].set(raw["bdec"][0, flat_ids])
    cls = jnp.zeros((CKp, Cp), jnp.float32).at[
        jnp.arange(CK), jnp.repeat(jnp.arange(C), K)].set(1.0 / K)

    return {
        "emb": raw["emb"],
        "wd": raw["wd"].astype(jnp.bfloat16),
        "bd": raw["bd"],
        "gamma": raw["gamma"],
        "beta": raw["beta"],
        "wsel": wsel.astype(jnp.bfloat16),
        "bsel": bsel,
        "cls": cls,
    }


# ----------------------------------------------------------------------------
# Forward pass (synthetic backbone glue + fused Pallas head/verbalizer)
# ----------------------------------------------------------------------------
def maskit_forward(params, input_ids, attention_mask, mask_token_id, n_classes):
    B = input_ids.shape[0]
    mask_index = mask_token_id[:, 0].astype(jnp.int32)                    # squeeze(1)
    rows = jnp.arange(B)
    # TODO(synk): synthetic backbone (embedding lookup + mask multiply) stands in
    # for the pretrained transformer encoder.
    # Only the [MASK]-position hidden state feeds the classifier, so gather the
    # token ids first and embed just those rows (O(B*H), not O(B*S*H)).
    mask_tok = input_ids[rows, mask_index]                                # (B,)
    mask_att = attention_mask[rows, mask_index].astype(jnp.float32)       # (B,)
    hm = params["emb"][mask_tok] * mask_att[:, None]                      # (B, H) f32
    hm = hm.astype(jnp.bfloat16)                                          # stream bf16
    scores = fused_head_verbalizer(hm, params["wd"], params["bd"], params["gamma"],
                                   params["beta"], params["wsel"], params["bsel"],
                                   params["cls"])                         # (Bp, Cp)
    return scores[:B, :n_classes]                                         # (B, C)


def maskit_reference(raw, input_ids, attention_mask, mask_token_id, label_word_ids):
    """Plain-JAX reference mirroring the PyTorch verbalizer semantics (same
    bf16-matmul / f32-accumulate precision policy as the kernel), computed the
    slow way: full (B, S, V) logits, then gather + verbalize."""
    B = input_ids.shape[0]
    mask_index = mask_token_id[:, 0]
    h = raw["emb"][input_ids] * attention_mask[..., None].astype(jnp.float32)
    wd_bf = raw["wd"].astype(jnp.bfloat16)
    t = jnp.dot(h.astype(jnp.bfloat16), wd_bf,
                preferred_element_type=jnp.float32) + raw["bd"]
    t = jax.nn.gelu(t, approximate=True)
    mu = t.mean(-1, keepdims=True)
    var = ((t - mu) ** 2).mean(-1, keepdims=True)
    t = (t - mu) * jax.lax.rsqrt(var + 1e-12) * raw["gamma"] + raw["beta"]
    wdec_bf = raw["wdec"].astype(jnp.bfloat16)
    logits = jnp.dot(t.astype(jnp.bfloat16), wdec_bf,
                     preferred_element_type=jnp.float32) + raw["bdec"]     # (B, S, V)
    rows = logits[jnp.arange(B), mask_index]                               # (B, V)
    picked = rows[:, jnp.array(label_word_ids)]                            # (B, C, K)
    C, K = picked.shape[1], picked.shape[2]
    p = jax.nn.softmax(picked.reshape(B, -1), axis=-1).reshape(B, C, K)
    logp = jnp.log(p + 1e-15)
    return logp.sum(-1) / jnp.ones_like(logp).sum(-1)                      # (B, C)


if __name__ == "__main__":
    B, S, H, V = 2, 8, 32, 128            # batch, seq, hidden, vocab
    # verbalizer_map: 2 classes, 2 label words per class (token ids, no specials)
    label_word_ids = [[5, 17], [42, 99]]
    C = len(label_word_ids)

    key = jax.random.PRNGKey(0)
    ks = jax.random.split(key, 8)
    raw = {
        "emb":   jax.random.normal(ks[0], (V, H), jnp.float32) * 0.5,
        "wd":    jax.random.normal(ks[1], (H, H), jnp.float32) * 0.1,
        "bd":    jax.random.normal(ks[2], (1, H), jnp.float32) * 0.01,
        "gamma": jnp.ones((1, H), jnp.float32),
        "beta":  jnp.zeros((1, H), jnp.float32),
        "wdec":  jax.random.normal(ks[3], (H, V), jnp.float32) * 0.1,
        "bdec":  jax.random.normal(ks[4], (1, V), jnp.float32) * 0.01,
    }
    params = prepare_head_params(raw, label_word_ids)

    input_ids = jax.random.randint(ks[5], (B, S), 0, V, dtype=jnp.int32)
    attention_mask = jnp.ones((B, S), jnp.int32)
    # position of the [MASK] token in each sequence, shape (B, 1) like the kwarg
    mask_token_id = jax.random.randint(ks[6], (B, 1), 0, S, dtype=jnp.int32)

    fwd = jax.jit(maskit_forward, static_argnums=(4,))
    out = jax.block_until_ready(fwd(params, input_ids, attention_mask,
                                    mask_token_id, C))

    ref = maskit_reference(raw, input_ids, attention_mask, mask_token_id,
                           label_word_ids)

    assert out.shape == (B, C), out.shape
    assert jnp.allclose(out, ref, rtol=1e-3, atol=1e-4), (out, ref)
    print("KERNEL_OK")
</pallas_src>

<mosaic_0001>
module attributes {stable_mosaic.version = 11 : i64} {
  func.func @fused_head_verbalizer_kernel(%arg0: i32, %arg1: memref<8x32xbf16, #tpu.memory_space<vmem>>, %arg2: memref<32x32xbf16, #tpu.memory_space<vmem>>, %arg3: memref<1x32xf32, #tpu.memory_space<vmem>>, %arg4: memref<1x32xf32, #tpu.memory_space<vmem>>, %arg5: memref<1x32xf32, #tpu.memory_space<vmem>>, %arg6: memref<32x128xbf16, #tpu.memory_space<vmem>>, %arg7: memref<1x128xf32, #tpu.memory_space<vmem>>, %arg8: memref<128x128xf32, #tpu.memory_space<vmem>>, %arg9: memref<8x128xf32, #tpu.memory_space<vmem>>) attributes {dimension_semantics = [#tpu.dimension_semantics<parallel>], iteration_bounds = array<i64: 1>, scalar_prefetch = 0 : i64, scratch_operands = 0 : i64, tpu.core_type = #tpu.core_type<tc>, window_params = [{transform_indices = @transform_0, window_bounds = array<i64: 8, 32>}, {pipeline_mode = #tpu.pipeline_mode<synchronous>, transform_indices = @transform_1, window_bounds = array<i64: 32, 32>}, {pipeline_mode = #tpu.pipeline_mode<synchronous>, transform_indices = @transform_2, window_bounds = array<i64: 1, 32>}, {pipeline_mode = #tpu.pipeline_mode<synchronous>, transform_indices = @transform_3, window_bounds = array<i64: 1, 32>}, {pipeline_mode = #tpu.pipeline_mode<synchronous>, transform_indices = @transform_4, window_bounds = array<i64: 1, 32>}, {pipeline_mode = #tpu.pipeline_mode<synchronous>, transform_indices = @transform_5, window_bounds = array<i64: 32, 128>}, {pipeline_mode = #tpu.pipeline_mode<synchronous>, transform_indices = @transform_6, window_bounds = array<i64: 1, 128>}, {pipeline_mode = #tpu.pipeline_mode<synchronous>, transform_indices = @transform_7, window_bounds = array<i64: 128, 128>}, {transform_indices = @transform_8, window_bounds = array<i64: 8, 128>}]} {
    %c0 = arith.constant 0 : index
    %c0_0 = arith.constant 0 : index
    %0 = vector.load %arg1[%c0, %c0_0] : memref<8x32xbf16, #tpu.memory_space<vmem>>, vector<8x32xbf16>
    %c0_1 = arith.constant 0 : index
    %c0_2 = arith.constant 0 : index
    %1 = vector.load %arg2[%c0_1, %c0_2] : memref<32x32xbf16, #tpu.memory_space<vmem>>, vector<32x32xbf16>
    %cst = arith.constant dense<0.000000e+00> : vector<8x32xf32>
    %2 = tpu.matmul %0, %1, %cst {dimension_numbers = #tpu.dot_dimension_numbers<[1], [0], [0], [1], [0, 0, 1, 1], [], []>} : vector<8x32xbf16>, vector<32x32xbf16>, vector<8x32xf32> -> vector<8x32xf32>
    %c0_3 = arith.constant 0 : index
    %c0_4 = arith.constant 0 : index
    %3 = vector.load %arg3[%c0_3, %c0_4] : memref<1x32xf32, #tpu.memory_space<vmem>>, vector<1x32xf32>
    %4 = vector.broadcast %3 : vector<1x32xf32> to vector<8x32xf32>
    %5 = arith.addf %2, %4 : vector<8x32xf32>
    %6 = arith.mulf %5, %5 : vector<8x32xf32>
    %7 = arith.mulf %5, %6 : vector<8x32xf32>
    %cst_5 = arith.constant 4.471500e-02 : f32
    %8 = vector.broadcast %cst_5 : f32 to vector<8x32xf32>
    %9 = arith.mulf %8, %7 : vector<8x32xf32>
    %10 = arith.addf %5, %9 : vector<8x32xf32>
    %cst_6 = arith.constant 0.797884583 : f32
    %11 = vector.broadcast %cst_6 : f32 to vector<8x32xf32>
    %12 = arith.mulf %11, %10 : vector<8x32xf32>
    %13 = math.tanh %12 : vector<8x32xf32>
    %cst_7 = arith.constant 1.000000e+00 : f32
    %14 = vector.broadcast %cst_7 : f32 to vector<8x32xf32>
    %15 = arith.addf %14, %13 : vector<8x32xf32>
    %cst_8 = arith.constant 5.000000e-01 : f32
    %16 = vector.broadcast %cst_8 : f32 to vector<8x32xf32>
    %17 = arith.mulf %16, %15 : vector<8x32xf32>
    %18 = arith.mulf %5, %17 : vector<8x32xf32>
    %cst_9 = arith.constant dense<0.000000e+00> : vector<8xf32>
    %19 = vector.multi_reduction <add>, %18, %cst_9 [1] : vector<8x32xf32> to vector<8xf32>
    %20 = vector.shape_cast %19 : vector<8xf32> to vector<8x1xf32>
    %cst_10 = arith.constant 3.200000e+01 : f32
    %21 = vector.broadcast %cst_10 : f32 to vector<8x1xf32>
    %22 = arith.divf %20, %21 : vector<8x1xf32>
    %23 = vector.broadcast %22 : vector<8x1xf32> to vector<8x32xf32>
    %24 = arith.subf %18, %23 : vector<8x32xf32>
    %25 = arith.mulf %24, %24 : vector<8x32xf32>
    %cst_11 = arith.constant dense<0.000000e+00> : vector<8xf32>
    %26 = vector.multi_reduction <add>, %25, %cst_11 [1] : vector<8x32xf32> to vector<8xf32>
    %27 = vector.shape_cast %26 : vector<8xf32> to vector<8x1xf32>
    %cst_12 = arith.constant 3.200000e+01 : f32
    %28 = vector.broadcast %cst_12 : f32 to vector<8x1xf32>
    %29 = arith.divf %27, %28 : vector<8x1xf32>
    %30 = vector.broadcast %22 : vector<8x1xf32> to vector<8x32xf32>
    %31 = arith.subf %18, %30 : vector<8x32xf32>
    %cst_13 = arith.constant 9.99999996E-13 : f32
    %32 = vector.broadcast %cst_13 : f32 to vector<8x1xf32>
    %33 = arith.addf %29, %32 : vector<8x1xf32>
    %34 = math.rsqrt %33 : vector<8x1xf32>
    %35 = vector.broadcast %34 : vector<8x1xf32> to vector<8x32xf32>
    %36 = arith.mulf %31, %35 : vector<8x32xf32>
    %c0_14 = arith.constant 0 : index
    %c0_15 = arith.constant 0 : index
    %37 = vector.load %arg4[%c0_14, %c0_15] : memref<1x32xf32, #tpu.memory_space<vmem>>, vector<1x32xf32>
    %38 = vector.broadcast %37 : vector<1x32xf32> to vector<8x32xf32>
    %39 = arith.mulf %36, %38 : vector<8x32xf32>
    %c0_16 = arith.constant 0 : index
    %c0_17 = arith.constant 0 : index
    %40 = vector.load %arg5[%c0_16, %c0_17] : memref<1x32xf32, #tpu.memory_space<vmem>>, vector<1x32xf32>
    %41 = vector.broadcast %40 : vector<1x32xf32> to vector<8x32xf32>
    %42 = arith.addf %39, %41 : vector<8x32xf32>
    %43 = arith.truncf %42 : vector<8x32xf32> to vector<8x32xbf16>
    %c0_18 = arith.constant 0 : index
    %c0_19 = arith.constant 0 : index
    %44 = vector.load %arg6[%c0_18, %c0_19] : memref<32x128xbf16, #tpu.memory_space<vmem>>, vector<32x128xbf16>
    %cst_20 = arith.constant dense<0.000000e+00> : vector<8x128xf32>
    %45 = tpu.matmul %43, %44, %cst_20 {dimension_numbers = #tpu.dot_dimension_numbers<[1], [0], [0], [1], [0, 0, 1, 1], [], []>} : vector<8x32xbf16>, vector<32x128xbf16>, vector<8x128xf32> -> vector<8x128xf32>
    %c0_21 = arith.constant 0 : index
    %c0_22 = arith.constant 0 : index
    %46 = vector.load %arg7[%c0_21, %c0_22] : memref<1x128xf32, #tpu.memory_space<vmem>>, vector<1x128xf32>
    %47 = vector.broadcast %46 : vector<1x128xf32> to vector<8x128xf32>
    %48 = arith.addf %45, %47 : vector<8x128xf32>
    %cst_23 = arith.constant dense<0xFF800000> : vector<8xf32>
    %49 = vector.multi_reduction <maximumf>, %48, %cst_23 [1] : vector<8x128xf32> to vector<8xf32>
    %50 = vector.shape_cast %49 : vector<8xf32> to vector<8x1xf32>
    %51 = vector.broadcast %50 : vector<8x1xf32> to vector<8x128xf32>
    %52 = arith.subf %48, %51 : vector<8x128xf32>
    %53 = math.exp %52 : vector<8x128xf32>
    %cst_24 = arith.constant dense<0.000000e+00> : vector<8xf32>
    %54 = vector.multi_reduction <add>, %53, %cst_24 [1] : vector<8x128xf32> to vector<8xf32>
    %55 = vector.shape_cast %54 : vector<8xf32> to vector<8x1xf32>
    %56 = math.log %55 : vector<8x1xf32>
    %57 = vector.broadcast %56 : vector<8x1xf32> to vector<8x128xf32>
    %58 = arith.subf %52, %57 : vector<8x128xf32>
    %c0_25 = arith.constant 0 : index
    %c0_26 = arith.constant 0 : index
    %59 = vector.load %arg8[%c0_25, %c0_26] : memref<128x128xf32, #tpu.memory_space<vmem>>, vector<128x128xf32>
    %cst_27 = arith.constant dense<0.000000e+00> : vector<8x128xf32>
    %60 = tpu.matmul %58, %59, %cst_27 {dimension_numbers = #tpu.dot_dimension_numbers<[1], [0], [0], [1], [0, 0, 1, 1], [], []>} : vector<8x128xf32>, vector<128x128xf32>, vector<8x128xf32> -> vector<8x128xf32>
    %c0_28 = arith.constant 0 : index
    %c0_29 = arith.constant 0 : index
    %61 = vector.load %arg9[%c0_28, %c0_29] : memref<8x128xf32, #tpu.memory_space<vmem>>, vector<8x128xf32>
    tpu.vector_store %arg9[%c0_28, %c0_29], %60 {strides = array<i32>} : memref<8x128xf32, #tpu.memory_space<vmem>>, vector<8x128xf32>,
    return
  }
  func.func @transform_0(%arg0: i32) -> (i32, i32) {
    %c0_i32 = arith.constant 0 : i32
    %c0_i32_0 = arith.constant 0 : i32
    return %arg0, %c0_i32 : i32, i32
  }
  func.func @transform_1(%arg0: i32) -> (i32, i32) {
    %c0_i32 = arith.constant 0 : i32
    %c0_i32_0 = arith.constant 0 : i32
    %c0_i32_1 = arith.constant 0 : i32
    return %c0_i32, %c0_i32_0 : i32, i32
  }
  func.func @transform_2(%arg0: i32) -> (i32, i32) {
    %c0_i32 = arith.constant 0 : i32
    %c0_i32_0 = arith.constant 0 : i32
    %c0_i32_1 = arith.constant 0 : i32
    return %c0_i32, %c0_i32_0 : i32, i32
  }
  func.func @transform_3(%arg0: i32) -> (i32, i32) {
    %c0_i32 = arith.constant 0 : i32
    %c0_i32_0 = arith.constant 0 : i32
    %c0_i32_1 = arith.constant 0 : i32
    return %c0_i32, %c0_i32_0 : i32, i32
  }
  func.func @transform_4(%arg0: i32) -> (i32, i32) {
    %c0_i32 = arith.constant 0 : i32
    %c0_i32_0 = arith.constant 0 : i32
    %c0_i32_1 = arith.constant 0 : i32
    return %c0_i32, %c0_i32_0 : i32, i32
  }
  func.func @transform_5(%arg0: i32) -> (i32, i32) {
    %c0_i32 = arith.constant 0 : i32
    %c0_i32_0 = arith.constant 0 : i32
    %c0_i32_1 = arith.constant 0 : i32
    return %c0_i32, %c0_i32_0 : i32, i32
  }
  func.func @transform_6(%arg0: i32) -> (i32, i32) {
    %c0_i32 = arith.constant 0 : i32
    %c0_i32_0 = arith.constant 0 : i32
    %c0_i32_1 = arith.constant 0 : i32
    return %c0_i32, %c0_i32_0 : i32, i32
  }
  func.func @transform_7(%arg0: i32) -> (i32, i32) {
    %c0_i32 = arith.constant 0 : i32
    %c0_i32_0 = arith.constant 0 : i32
    %c0_i32_1 = arith.constant 0 : i32
    return %c0_i32, %c0_i32_0 : i32, i32
  }
  func.func @transform_8(%arg0: i32) -> (i32, i32) {
    %c0_i32 = arith.constant 0 : i32
    %c0_i32_0 = arith.constant 0 : i32
    return %arg0, %c0_i32 : i32, i32
  }
}

</mosaic_0001>

<bundles_post_ra>
// kernel: maskit_forward.1
= control target key start
LH: loop header
LB: loop body
LE: loop exit
PB: predicated region body
PF: predicated region fallthrough
CT: control target
= control target key end

     0   :  { %v403_v0 = vmov 0.0   ;;  %vm404_vm0 = vmmov 0   ;;  %vm54_vm1 = vcmask 261120   ;;  %s555_s1 = inlined_call_operand.vmem [shape: bf16[32,32], index: 1, kind: input, shape index: {}]   ;;  %s556_s0 = inlined_call_operand.vmem [shape: bf16[8,32], index: 0, kind: input, shape index: {}]   ;;  %s557_s2 = inlined_call_operand.vmem [shape: f32[1,32], index: 2, kind: input, shape index: {}]   ;;  %s558_s5 = inlined_call_operand.vmem [shape: bf16[32,128], index: 5, kind: input, shape index: {}]   ;;  %s559_s3 = inlined_call_operand.vmem [shape: f32[1,32], index: 3, kind: input, shape index: {}]   ;;  %s560_s4 = inlined_call_operand.vmem [shape: f32[1,32], index: 4, kind: input, shape index: {}]   ;;  %s561_s6 = inlined_call_operand.vmem [shape: f32[1,128], index: 6, kind: input, shape index: {}]   ;;  %s562_s7 = inlined_call_operand.vmem [shape: f32[128,128], index: 7, kind: input, shape index: {}]   ;;  %s563_s8 = inlined_call_operand.vmem [shape: f32[8,128], index: 8, kind: output, shape index: {}]  }
   0x1   :  { %338 = vmatprep.subr.bf16.mxu1 %v403_v0  ;;  %v391_v1 = vld [vmem:[%s555_s1 + $0x8] sm:$0xff]   ;;  %342 = vmatprep.mubr.msk.bf16.mxu1 %vm404_vm0, %v403_v0  ;;  %v392_v2 = vld [vmem:[%s555_s1] sm:$0xff]   ;;  %v229_v43 = vld [vmem:[%s562_s7 + $0x78] sm:$0xff] }
   0x2   :  { %354 = vmatprep.subr.mxu0 %v403_v0  ;;  %386 = vmatprep.mubr.msk.f32.mxu0 %vm404_vm0, %v403_v0  ;;  %v30_v3 = vld [vmem:[%s556_s0] sm:$0xf]  ;;  %v393_v25 = vld [vmem:[%s558_s5 + $0x8] sm:$0xff]   ;;  %v228_v44 = vld [vmem:[%s562_s7 + $0x70] sm:$0xff] }
   0x3   :  { %339 = vmatpush3.bf16.msra.mxu1 %v391_v1  ;;  %v305_v4 = vld [vmem:[%s557_s2] ss:$0 sm:$0xff]  ;;  %355 = vmatpush3.msra.mxu0 %v229_v43  ;;  %v227_v45 = vld [vmem:[%s562_s7 + $0x68] sm:$0xff]  ;;  %v225_v47 = vld [vmem:[%s562_s7 + $0x58] sm:$0xff] }
   0x4   :  { %340 = vmatprep.subr.bf16.mxu1 %v403_v0  ;;  %v394_v26 = vld [vmem:[%s558_s5] sm:$0xff]   ;;  %356 = vmatprep.subr.mxu0 %v403_v0  ;;  %v224_v48 = vld [vmem:[%s562_s7 + $0x50] sm:$0xff]  ;;  %v223_v49 = vld [vmem:[%s562_s7 + $0x48] sm:$0xff] }
   0x5   :  { %v309_v31 = vld [vmem:[%s559_s3] ss:$0 sm:$0xff]  ;;  %357 = vmatpush3.msra.mxu0 %v228_v44  ;;  %v221_v55 = vld [vmem:[%s562_s7 + $0x38] sm:$0xff]  ;;  %v220_v56 = vld [vmem:[%s562_s7 + $0x30] sm:$0xff] }
   0x6   :  { %v310_v33 = vld [vmem:[%s560_s4] ss:$0 sm:$0xff]  ;;  %358 = vmatprep.subr.mxu0 %v403_v0  ;;  %v219_v57 = vld [vmem:[%s562_s7 + $0x28] sm:$0xff]  ;;  %v217_v59 = vld [vmem:[%s562_s7 + $0x18] sm:$0xff] }
   0x7   :  { %341 = vmatpush3.bf16.msra.mxu1 %v392_v2  ;;  %v311_v37 = vld [vmem:[%s561_s6] ss:$0 sm:$0xff]  ;;  %359 = vmatpush3.msra.mxu0 %v227_v45  ;;  %v216_v60 = vld [vmem:[%s562_s7 + $0x10] sm:$0xff]  ;;  %v215_v61 = vld [vmem:[%s562_s7 + $0x8] sm:$0xff] }
   0x8   :  { %346 = vmatprep.subr.bf16.mxu1 %v403_v0  ;;  %v226_v46 = vld [vmem:[%s562_s7 + $0x60] sm:$0xff]  ;;  %360 = vmatprep.subr.mxu0 %v403_v0 }
   0x9   :  { %361 = vmatpush3.msra.mxu0 %v226_v46  ;;  %v222_v54 = vld [vmem:[%s562_s7 + $0x40] sm:$0xff] }
   0xa   :  { %343 = vmatmul.mubr.msk.bf16.vlgmr.msra.gmra.mxu1 %vm54_vm1, %v30_v3  ;;  %362 = vmatprep.subr.mxu0 %v403_v0  ;;  %v218_v58 = vld [vmem:[%s562_s7 + $0x20] sm:$0xff] }
   0xb   :  { %350 = vmatprep.mubr.msk.bf16.mxu1 %vm404_vm0, %v403_v0  ;;  %347 = vmatpush3.bf16.msra.mxu1 %v393_v25  ;;  %v214_v62 = vld [vmem:[%s562_s7] sm:$0xff] }
   0xc   :  { %348 = vmatprep.subr.bf16.mxu1 %v403_v0  ;;  %363 = vmatpush3.msra.mxu0 %v225_v47 }
   0xd   :  { %364 = vmatprep.subr.mxu0 %v403_v0 }
   0xe   :  { %365 = vmatpush3.msra.mxu0 %v224_v48 }
   0xf   :  { %349 = vmatpush3.bf16.msra.mxu1 %v394_v26  ;;  %366 = vmatprep.subr.mxu0 %v403_v0 }
  0x10   :  { %367 = vmatpush3.msra.mxu0 %v223_v49 }
  0x11   :  { %368 = vmatprep.subr.mxu0 %v403_v0 }
  0x12   :  { %369 = vmatpush3.msra.mxu0 %v222_v54 }
  0x13   :  { %370 = vmatprep.subr.mxu0 %v403_v0 }
  0x14   :  { %371 = vmatpush3.msra.mxu0 %v221_v55 }
  0x15   :  { %372 = vmatprep.subr.mxu0 %v403_v0 }
  0x16   :  { %373 = vmatpush3.msra.mxu0 %v220_v56 }
  0x17   :  { %374 = vmatprep.subr.mxu0 %v403_v0 }
  0x18   :  { %375 = vmatpush3.msra.mxu0 %v219_v57 }
  0x19   :  { %376 = vmatprep.subr.mxu0 %v403_v0 }
  0x1a   :  { %377 = vmatpush3.msra.mxu0 %v218_v58 }
  0x1b   :  { %378 = vmatprep.subr.mxu0 %v403_v0 }
  0x1c   :  { %379 = vmatpush3.msra.mxu0 %v217_v59 }
  0x1d   :  { %380 = vmatprep.subr.mxu0 %v403_v0 }
  0x1e   :  { %381 = vmatpush3.msra.mxu0 %v216_v60 }
  0x1f   :  { %382 = vmatprep.subr.mxu0 %v403_v0 }
  0x20   :  { %383 = vmatpush3.msra.mxu0 %v215_v61 }
  0x21   :  { %384 = vmatprep.subr.mxu0 %v403_v0 }
  0x22   :  { %385 = vmatpush3.msra.mxu0 %v214_v62 }
  0xca   :  { %v92_v5 = vpop.f32.mrf.mxu1 }
  0xcb   :  { %v93_v6 = vadd.f32 %v305_v4, %v92_v5 }
  0xcc   :  { %v344_v7 = vpop.f32.mrf.mxu1 }
  0xcd   :  { %v98_v8 = vmul.f32 %v93_v6, %v93_v6 }
  0xce   :  { %v95_v9 = vpop.f32.mrf.mxu1 }
  0xcf   :  { %v99_v10 = vmul.f32 %v98_v8, %v93_v6 }
  0xd0   :  { %v345_v11 = vpop.f32.mrf.mxu1 }
  0xd1   :  { %v100_v12 = vmul.f32 0.044715, %v99_v10 }
  0xd3   :  { %v101_v13 = vadd.f32 %v100_v12, %v93_v6 }
  0xd5   :  { %v102_v14 = vmul.f32 0.7978846, %v101_v13 }
  0xd7   :  { %395 = vtanh.f32 %v102_v14 }
  0xe4   :  { %v396_v15 = vpop.eup %395 }
  0xe5   :  { %v104_v16 = vadd.f32 1.0, %v396_v15 }
  0xe7   :  { %v105_v17 = vmul.f32 0.5, %v104_v16 }
  0xe9   :  { %v106_v18 = vmul.f32 %v105_v17, %v93_v6 }
  0xeb   :  { %v107_v19 = vsel %vm54_vm1, %v106_v18, 0.0 }
  0xec   :  { %108 = vadd.xlane.f32.xlu0 %v107_v19 }
 0x175   :  { %v109_v20 = vpop.xlane.xlu0 %108 }
 0x176   :  { %v111_v21 = vmul.f32 0.03125, %v109_v20 }
 0x178   :  { %v112_v22 = vsub.f32 %v106_v18, %v111_v21 }
 0x17a   :  { %v113_v23 = vmul.f32 %v112_v22, %v112_v22 }
 0x17c   :  { %v114_v24 = vsel %vm54_vm1, %v113_v23, 0.0 }
 0x17d   :  { %115 = vadd.xlane.f32.xlu0 %v114_v24 }
 0x206   :  { %v116_v27 = vpop.xlane.xlu0 %115 }
 0x207   :  { %v117_v28 = vmul.f32 0.03125, %v116_v27 }
 0x209   :  { %v118_v29 = vadd.f32 1e-12, %v117_v28 }
 0x20b   :  { %397 = vrsqrt.f32 %v118_v29 }
 0x218   :  { %v398_v30 = vpop.eup %397 }
 0x219   :  { %v120_v32 = vmul.f32 %v398_v30, %v112_v22 }
 0x21b   :  { %v128_v34 = vmul.f32 %v309_v31, %v120_v32 }
 0x21d   :  { %v136_v35 = vadd.f32 %v310_v33, %v128_v34 }
 0x21f   :  { %v137_v36 = vpack.c.bf16 %v136_v35, %v136_v35 }
 0x221   :  { %351 = vmatmul.mubr.msk.bf16.vlgmr.msra.gmra.mxu1 %vm54_vm1, %v137_v36 }
 0x2e1   :  { %v198_v38 = vpop.f32.mrf.mxu1 }
 0x2e2   :  { %v199_v39 = vadd.f32 %v311_v37, %v198_v38 }
 0x2e3   :  { %v352_v40 = vpop.f32.mrf.mxu1 }
 0x2e4   :  { %204 = vmax.xlane.f32.xlu1 %v199_v39 }
 0x2e5   :  { %v201_v41 = vpop.f32.mrf.mxu1 }
 0x2e7   :  { %v353_v42 = vpop.f32.mrf.mxu1 }
 0x36d   :  { %v205_v50 = vpop.xlane.xlu1 %204 }
 0x36e   :  { %v206_v51 = vsub.f32 %v199_v39, %v205_v50 }
 0x370   :  { %v207_v52 = vmul.f32 1.442695, %v206_v51 }
 0x372   :  { %399 = vpow2.f32 %v207_v52 }
 0x37f   :  { %v400_v53 = vpop.eup %399 }
 0x380   :  { %209 = vadd.xlane.f32.xlu1 %v400_v53 }
 0x409   :  { %v210_v63 = vpop.xlane.xlu1 %209 }
 0x40a   :  { %401 = vlog2.f32 %v210_v63 }
 0x417   :  { %v402_v1 = vpop.eup %401 }
 0x418   :  { %v212_v2 = vmul.f32 0.6931472, %v402_v1 }
 0x41a   :  { %v213_v3 = vsub.f32 %v206_v51, %v212_v2 }
 0x41c   :  { %387 = vmatmul.mubr.f32.vlgmr.msra.gmra.mxu0 %v213_v3 }
 0x4dc   :  { %v296_v4 = vpop.f32.mrf.mxu0 }
 0x4dd   :  { %300 = vst [vmem:[%s563_s8] sm:$0xff] %v296_v4 }
 0x4de   :  { %v388_v5 = vpop.f32.mrf.mxu0 }

</bundles_post_ra>
